<compile_context>
chip_gen: v5e
topology: v5e:2x2
jax: 0.10.0
libtpu: 0.0.40
codegen_flags: <defaults>
</compile_context>

<pallas_src>
import functools

import jax
import jax.numpy as jnp
from jax import lax
from jax.experimental import pallas as pl
from jax.experimental.pallas import tpu as pltpu


def _round_up(x, m):
    return (x + m - 1) // m * m


def _focal_ce_kernel(logits_ref, target_ref, out_ref,
                     m_ref, s_ref, picked_ref, *,
                     tile_n, tile_c, n_valid, mask_rows):
    """One (row-tile, class-tile) step of an online-logsumexp cross entropy.

    Grid: (num_row_tiles ["parallel"], num_class_tiles ["arbitrary"]).
    On the last class tile the row tile's summed CE is broadcast into its own
    lane-dense (8, 128) output slab (unmasked vst; summed in a JAX epilogue).
    """
    i = pl.program_id(0)          # row (batch) tile
    j = pl.program_id(1)          # class tile

    # --- init per-row online-logsumexp state on the first class tile ---
    @pl.when(j == 0)
    def _():
        m_ref[...] = jnp.full_like(m_ref, -jnp.inf)
        s_ref[...] = jnp.zeros_like(s_ref)
        picked_ref[...] = jnp.zeros_like(picked_ref)

    logits = logits_ref[...].astype(jnp.float32)     # (TILE_N, TILE_C)
    tgt = target_ref[...]                            # (TILE_N, 1) int32

    # --- online logsumexp update (stable) ---
    m_prev = m_ref[...]
    m_new = jnp.maximum(m_prev, jnp.max(logits, axis=-1, keepdims=True))
    alpha = jnp.exp(m_prev - m_new)                  # 0 on the first tile
    s_ref[...] = alpha * s_ref[...] + jnp.sum(jnp.exp(logits - m_new),
                                              axis=-1, keepdims=True)
    m_ref[...] = m_new

    # --- gather logits[row, target] via compare/select (VPU only, no MXU) ---
    col = j * tile_c + lax.broadcasted_iota(jnp.int32, logits.shape, 1)
    picked_ref[...] += jnp.sum(jnp.where(col == tgt, logits, 0.0),
                               axis=-1, keepdims=True)

    # --- finalize this row tile on the last class tile ---
    @pl.when(j == pl.num_programs(1) - 1)
    def _():
        ce = m_ref[...] + jnp.log(s_ref[...]) - picked_ref[...]   # (TILE_N, 1)
        if mask_rows:  # trace-time: only emitted when batch padding exists
            row = i * tile_n + lax.broadcasted_iota(jnp.int32, ce.shape, 0)
            ce = jnp.where(row < n_valid, ce, 0.0)
        partial = jnp.sum(ce)
        out_ref[...] = jnp.full((8, 128), partial, dtype=jnp.float32)


def focal_loss(logits, targets, gamma=0.0, eps=1e-7):
    """logits: (N, C) float32/bfloat16, targets: (N,) int -> scalar float32.

    Matches the PyTorch reference forward: logp = mean CE over the batch,
    loss = (1 - exp(-logp))**gamma * logp.
    NOTE: `eps` is unused in the PyTorch reference forward as well; kept for parity.
    """
    n, c = logits.shape
    gamma = float(gamma)
    itemsize = jnp.dtype(logits.dtype).itemsize
    targets2d = targets.astype(jnp.int32).reshape(n, 1)

    # ---------------- per-generation VMEM budgeting ----------------
    try:
        vmem_cap = int(pltpu.get_tpu_info().vmem_capacity_bytes)
    except Exception:
        vmem_cap = 64 * 1024 * 1024          # unknown -> be conservative (v7x-like)
    if vmem_cap >= 100 * 1024 * 1024:        # v5e / v6e: 128 MiB physical VMEM
        budget = 24 * 1024 * 1024            # working-set budget
        vmem_limit = 64 * 1024 * 1024
    else:                                    # v7x: 64 MiB physical / 32 MiB scoped
        budget = 12 * 1024 * 1024
        vmem_limit = 32 * 1024 * 1024

    # Working-set bytes per logits element: double-buffered input tile plus the
    # in-kernel f32 upcast and f32 exp temporaries.
    per_elem = 2 * itemsize + 8
    # (TILE_N, 1) buffers are lane-padded to 128 in VMEM: 2x targets
    # (double-buffered int32) + 3x f32 scratch (m, s, picked).
    fixed_row_bytes = 5 * 128 * 4

    # ---------------- class-axis tiling decision ----------------
    # Keep the whole class axis in one tile unless that would squeeze the row
    # tile below ~128 rows; otherwise tile classes with the online logsumexp.
    if budget // (c * per_elem + fixed_row_bytes) >= 128:
        tile_c = c
    else:
        tile_c = 1024                        # lane-dense (multiple of 128)
    c_pad = _round_up(c, tile_c)

    # ---------------- row tile sized purely from the VMEM budget ----------------
    rows = budget // (tile_c * per_elem + fixed_row_bytes)
    tile_n = max(8, min(rows, _round_up(n, 8)) // 8 * 8)
    # Rebalance so the batch-padding waste stays small even for tall tiles.
    num_row_tiles = -(-n // tile_n)
    tile_n = _round_up(-(-n // num_row_tiles), 8)
    n_pad = num_row_tiles * tile_n
    mask_rows = n_pad != n

    # ---------------- padding (trace-time, only when needed) ----------------
    if c_pad != c:
        # Pad classes with dtype-min so they never win the max / contribute to s.
        logits = jnp.pad(logits, ((0, 0), (0, c_pad - c)),
                         constant_values=float(jnp.finfo(logits.dtype).min))
    if mask_rows:
        logits = jnp.pad(logits, ((0, n_pad - n), (0, 0)))
        targets2d = jnp.pad(targets2d, ((0, n_pad - n), (0, 0)))

    num_class_tiles = c_pad // tile_c
    grid = (num_row_tiles, num_class_tiles)

    kernel = functools.partial(_focal_ce_kernel, tile_n=tile_n, tile_c=tile_c,
                               n_valid=n, mask_rows=mask_rows)

    cost = pl.CostEstimate(
        flops=int(6 * n * c),
        transcendentals=int(n * c),
        bytes_accessed=int(n * c * itemsize + n * 4 + num_row_tiles * 8 * 128 * 4),
    )

    partial_slabs = pl.pallas_call(
        kernel,
        out_shape=jax.ShapeDtypeStruct((num_row_tiles * 8, 128), jnp.float32),
        grid_spec=pltpu.PrefetchScalarGridSpec(
            num_scalar_prefetch=0,
            grid=grid,
            in_specs=[
                pl.BlockSpec((tile_n, tile_c), lambda i, j: (i, j)),
                pl.BlockSpec((tile_n, 1), lambda i, j: (i, 0)),
            ],
            out_specs=pl.BlockSpec((8, 128), lambda i, j: (i, 0)),
            scratch_shapes=[
                pltpu.VMEM((tile_n, 1), jnp.float32),   # running max m
                pltpu.VMEM((tile_n, 1), jnp.float32),   # running sum s
                pltpu.VMEM((tile_n, 1), jnp.float32),   # picked target logit
            ],
        ),
        compiler_params=pltpu.CompilerParams(
            dimension_semantics=("parallel", "arbitrary"),
            vmem_limit_bytes=vmem_limit,
        ),
        cost_estimate=cost,
    )(logits, targets2d)

    # ---------------- tiny JAX epilogue: mean CE + focal modulation ----------------
    logp = jnp.sum(partial_slabs[0::8, 0]) / jnp.float32(n)
    if gamma == 0.0:
        # (1 - p)^0 == 1: avoid 0**0 / log(0) issues entirely at trace time.
        return logp
    p = jnp.exp(-logp)
    base = jnp.maximum(1.0 - p, 0.0)          # clamp fp rounding
    return base ** jnp.float32(gamma) * logp


if __name__ == "__main__":
    key = jax.random.PRNGKey(0)
    k_logits, k_tgt = jax.random.split(key)

    N, C = 8, 32  # batch of 8 samples, 32 classes
    logits = jax.random.normal(k_logits, (N, C), dtype=jnp.float32)
    targets = jax.random.randint(k_tgt, (N,), 0, C, dtype=jnp.int32)

    gamma = 2.0
    loss = focal_loss(logits, targets, gamma=gamma)
    jax.block_until_ready(loss)

    # quick sanity check against a pure-JAX reference
    logp_ref = jnp.mean(
        jax.nn.logsumexp(logits, axis=-1) - logits[jnp.arange(N), targets]
    )
    ref = (1.0 - jnp.exp(-logp_ref)) ** gamma * logp_ref
    assert jnp.allclose(loss, ref, rtol=1e-5, atol=1e-5), (loss, ref)

    # also check the gamma == 0 path (pure mean cross entropy)
    loss0 = focal_loss(logits, targets, gamma=0.0)
    jax.block_until_ready(loss0)
    assert jnp.allclose(loss0, logp_ref, rtol=1e-5, atol=1e-5), (loss0, logp_ref)

    print("KERNEL_OK")
</pallas_src>

<mosaic_0001>
module attributes {stable_mosaic.version = 11 : i64} {
  func.func @_focal_ce_kernel(%arg0: i32, %arg1: i32, %arg2: memref<8x32xf32, #tpu.memory_space<vmem>>, %arg3: memref<8x1xi32, #tpu.memory_space<vmem>>, %arg4: memref<8x128xf32, #tpu.memory_space<vmem>>, %arg5: memref<8x1xf32, #tpu.memory_space<vmem>>, %arg6: memref<8x1xf32, #tpu.memory_space<vmem>>, %arg7: memref<8x1xf32, #tpu.memory_space<vmem>>) attributes {dimension_semantics = [#tpu.dimension_semantics<parallel>, #tpu.dimension_semantics<arbitrary>], iteration_bounds = array<i64: 1, 1>, scalar_prefetch = 0 : i64, scratch_operands = 3 : i64, tpu.core_type = #tpu.core_type<tc>, window_params = [{transform_indices = @transform_0, window_bounds = array<i64: 8, 32>}, {transform_indices = @transform_1, window_bounds = array<i64: 8, 1>}, {transform_indices = @transform_2, window_bounds = array<i64: 8, 128>}]} {
    %c0_i32 = arith.constant 0 : i32
    %0 = arith.cmpi eq, %arg1, %c0_i32 : i32
    %1 = arith.extui %0 : i1 to i32
    %c0_i32_0 = arith.constant 0 : i32
    %2 = arith.cmpi ne, %1, %c0_i32_0 : i32
    scf.if %2 {
      %cst_21 = arith.constant 0xFF800000 : f32
      %37 = vector.broadcast %cst_21 : f32 to vector<8x1xf32>
      %c0_22 = arith.constant 0 : index
      %c0_23 = arith.constant 0 : index
      %38 = vector.load %arg5[%c0_22, %c0_23] : memref<8x1xf32, #tpu.memory_space<vmem>>, vector<8x1xf32>
      tpu.vector_store %arg5[%c0_22, %c0_23], %37 {strides = array<i32>} : memref<8x1xf32, #tpu.memory_space<vmem>>, vector<8x1xf32>,
      %cst_24 = arith.constant 0.000000e+00 : f32
      %39 = vector.broadcast %cst_24 : f32 to vector<8x1xf32>
      %c0_25 = arith.constant 0 : index
      %c0_26 = arith.constant 0 : index
      %40 = vector.load %arg6[%c0_25, %c0_26] : memref<8x1xf32, #tpu.memory_space<vmem>>, vector<8x1xf32>
      tpu.vector_store %arg6[%c0_25, %c0_26], %39 {strides = array<i32>} : memref<8x1xf32, #tpu.memory_space<vmem>>, vector<8x1xf32>,
      %cst_27 = arith.constant 0.000000e+00 : f32
      %41 = vector.broadcast %cst_27 : f32 to vector<8x1xf32>
      %c0_28 = arith.constant 0 : index
      %c0_29 = arith.constant 0 : index
      %42 = vector.load %arg7[%c0_28, %c0_29] : memref<8x1xf32, #tpu.memory_space<vmem>>, vector<8x1xf32>
      tpu.vector_store %arg7[%c0_28, %c0_29], %41 {strides = array<i32>} : memref<8x1xf32, #tpu.memory_space<vmem>>, vector<8x1xf32>,
    } else {
    }
    %c0 = arith.constant 0 : index
    %c0_1 = arith.constant 0 : index
    %3 = vector.load %arg2[%c0, %c0_1] : memref<8x32xf32, #tpu.memory_space<vmem>>, vector<8x32xf32>
    %c0_2 = arith.constant 0 : index
    %c0_3 = arith.constant 0 : index
    %4 = vector.load %arg3[%c0_2, %c0_3] : memref<8x1xi32, #tpu.memory_space<vmem>>, vector<8x1xi32>
    %c0_4 = arith.constant 0 : index
    %c0_5 = arith.constant 0 : index
    %5 = vector.load %arg5[%c0_4, %c0_5] : memref<8x1xf32, #tpu.memory_space<vmem>>, vector<8x1xf32>
    %cst = arith.constant dense<0xFF800000> : vector<8xf32>
    %6 = vector.multi_reduction <maximumf>, %3, %cst [1] : vector<8x32xf32> to vector<8xf32>
    %7 = vector.shape_cast %6 : vector<8xf32> to vector<8x1xf32>
    %8 = arith.maximumf %5, %7 : vector<8x1xf32>
    %9 = arith.subf %5, %8 : vector<8x1xf32>
    %10 = math.exp %9 : vector<8x1xf32>
    %c0_6 = arith.constant 0 : index
    %c0_7 = arith.constant 0 : index
    %11 = vector.load %arg6[%c0_6, %c0_7] : memref<8x1xf32, #tpu.memory_space<vmem>>, vector<8x1xf32>
    %12 = arith.mulf %10, %11 : vector<8x1xf32>
    %13 = vector.broadcast %8 : vector<8x1xf32> to vector<8x32xf32>
    %14 = arith.subf %3, %13 : vector<8x32xf32>
    %15 = math.exp %14 : vector<8x32xf32>
    %cst_8 = arith.constant dense<0.000000e+00> : vector<8xf32>
    %16 = vector.multi_reduction <add>, %15, %cst_8 [1] : vector<8x32xf32> to vector<8xf32>
    %17 = vector.shape_cast %16 : vector<8xf32> to vector<8x1xf32>
    %18 = arith.addf %12, %17 : vector<8x1xf32>
    %c0_9 = arith.constant 0 : index
    %c0_10 = arith.constant 0 : index
    %19 = vector.load %arg6[%c0_9, %c0_10] : memref<8x1xf32, #tpu.memory_space<vmem>>, vector<8x1xf32>
    tpu.vector_store %arg6[%c0_9, %c0_10], %18 {strides = array<i32>} : memref<8x1xf32, #tpu.memory_space<vmem>>, vector<8x1xf32>,
    %c0_11 = arith.constant 0 : index
    %c0_12 = arith.constant 0 : index
    %20 = vector.load %arg5[%c0_11, %c0_12] : memref<8x1xf32, #tpu.memory_space<vmem>>, vector<8x1xf32>
    tpu.vector_store %arg5[%c0_11, %c0_12], %8 {strides = array<i32>} : memref<8x1xf32, #tpu.memory_space<vmem>>, vector<8x1xf32>,
    %c32_i32 = arith.constant 32 : i32
    %21 = arith.muli %arg1, %c32_i32 : i32
    %22 = tpu.iota {dimensions = array<i32: 1>} : vector<8x32xi32>
    %23 = vector.broadcast %21 : i32 to vector<8x32xi32>
    %24 = arith.addi %23, %22 : vector<8x32xi32>
    %c0_13 = arith.constant 0 : index
    %c0_14 = arith.constant 0 : index
    %25 = vector.load %arg7[%c0_13, %c0_14] : memref<8x1xf32, #tpu.memory_space<vmem>>, vector<8x1xf32>
    %26 = vector.broadcast %4 : vector<8x1xi32> to vector<8x32xi32>
    %27 = arith.cmpi eq, %24, %26 : vector<8x32xi32>
    %cst_15 = arith.constant 0.000000e+00 : f32
    %28 = vector.broadcast %cst_15 : f32 to vector<8x32xf32>
    %29 = arith.select %27, %3, %28 : vector<8x32xi1>, vector<8x32xf32>
    %cst_16 = arith.constant dense<0.000000e+00> : vector<8xf32>
    %30 = vector.multi_reduction <add>, %29, %cst_16 [1] : vector<8x32xf32> to vector<8xf32>
    %31 = vector.shape_cast %30 : vector<8xf32> to vector<8x1xf32>
    %32 = arith.addf %25, %31 : vector<8x1xf32>
    %c0_17 = arith.constant 0 : index
    %c0_18 = arith.constant 0 : index
    %33 = vector.load %arg7[%c0_17, %c0_18] : memref<8x1xf32, #tpu.memory_space<vmem>>, vector<8x1xf32>
    tpu.vector_store %arg7[%c0_17, %c0_18], %32 {strides = array<i32>} : memref<8x1xf32, #tpu.memory_space<vmem>>, vector<8x1xf32>,
    %c0_i32_19 = arith.constant 0 : i32
    %34 = arith.cmpi eq, %arg1, %c0_i32_19 : i32
    %35 = arith.extui %34 : i1 to i32
    %c0_i32_20 = arith.constant 0 : i32
    %36 = arith.cmpi ne, %35, %c0_i32_20 : i32
    scf.if %36 {
      %c0_21 = arith.constant 0 : index
      %c0_22 = arith.constant 0 : index
      %37 = vector.load %arg5[%c0_21, %c0_22] : memref<8x1xf32, #tpu.memory_space<vmem>>, vector<8x1xf32>
      %c0_23 = arith.constant 0 : index
      %c0_24 = arith.constant 0 : index
      %38 = vector.load %arg6[%c0_23, %c0_24] : memref<8x1xf32, #tpu.memory_space<vmem>>, vector<8x1xf32>
      %39 = math.log %38 : vector<8x1xf32>
      %40 = arith.addf %37, %39 : vector<8x1xf32>
      %c0_25 = arith.constant 0 : index
      %c0_26 = arith.constant 0 : index
      %41 = vector.load %arg7[%c0_25, %c0_26] : memref<8x1xf32, #tpu.memory_space<vmem>>, vector<8x1xf32>
      %42 = arith.subf %40, %41 : vector<8x1xf32>
      %43 = vector.shape_cast %42 : vector<8x1xf32> to vector<1x8x1xf32>
      %cst_27 = arith.constant dense<0.000000e+00> : vector<1xf32>
      %44 = vector.multi_reduction <add>, %43, %cst_27 [1, 2] : vector<1x8x1xf32> to vector<1xf32>
      %45 = vector.shape_cast %44 : vector<1xf32> to vector<1x1x1xf32>
      %46 = vector.extract %45[0, 0, 0] : f32 from vector<1x1x1xf32>
      %47 = vector.broadcast %46 : f32 to vector<8x128xf32>
      %c0_28 = arith.constant 0 : index
      %c0_29 = arith.constant 0 : index
      %48 = vector.load %arg4[%c0_28, %c0_29] : memref<8x128xf32, #tpu.memory_space<vmem>>, vector<8x128xf32>
      tpu.vector_store %arg4[%c0_28, %c0_29], %47 {strides = array<i32>} : memref<8x128xf32, #tpu.memory_space<vmem>>, vector<8x128xf32>,
    } else {
    }
    return
  }
  func.func @transform_0(%arg0: i32, %arg1: i32) -> (i32, i32) {
    %c0_i32 = arith.constant 0 : i32
    return %arg0, %arg1 : i32, i32
  }
  func.func @transform_1(%arg0: i32, %arg1: i32) -> (i32, i32) {
    %c0_i32 = arith.constant 0 : i32
    %c0_i32_0 = arith.constant 0 : i32
    return %arg0, %c0_i32 : i32, i32
  }
  func.func @transform_2(%arg0: i32, %arg1: i32) -> (i32, i32) {
    %c0_i32 = arith.constant 0 : i32
    %c0_i32_0 = arith.constant 0 : i32
    return %arg0, %c0_i32 : i32, i32
  }
}

</mosaic_0001>

<bundles_post_ra>
// kernel: tpu_custom_call.1
= control target key start
LH: loop header
LB: loop body
LE: loop exit
PB: predicated region body
PF: predicated region fallthrough
CT: control target
= control target key end

     0   :  { %vm23_vm0 = vcmask 261120   ;;  %s180_s0 = inlined_call_operand.vmem [shape: f32[8,32], index: 0, kind: input, shape index: {}]   ;;  %s181_s1 = inlined_call_operand.vmem [shape: s32[8,1], index: 1, kind: input, shape index: {}]   ;;  %s182_s2 = inlined_call_operand.hbm [shape: f32[8,128], index: 2, kind: output, shape index: {}]  }
   0x1   :  { %v20_v0 = vld [vmem:[%s180_s0] sm:$0xff] }
   0x2   :  { %7 = vsyncpa [#allocation6], 0  ;;  %v24_v1 = vsel %vm23_vm0, %v20_v0, -inf  ;;  %vm16_vm1 = vcmask 7168   ;;  %v142_v2 = vmov -inf   ;;  %v143_v3 = vmov 0  }
   0x3   :  { %25 = vmax.xlane.f32.xlu0 %v24_v1  ;;  %17 = vst.msk [vmem:[#allocation2] sm:$0xff] %vm16_vm1, %v142_v2  ;;  %109 = vset.pattern.permute.xlu1 %v143_v3  ;;  %v144_v4 = vmov 0.0   ;;  %v21_v5 = vld [vmem:[%s181_s1] sm:$0xff]  ;;  %v49_v10 = vlaneseq  ;;  %s145_s0 = smov [#allocation5]   ;;  %s93_s15 = sshll.u32 %s182_s2, 4  ;;  %s94_s15 = int_to_ptr.hbm [resolvable:$true] %s93_s15 }
   0x4   :  { %108 = vset.pattern.permute.xlu0 %v143_v3  ;;  %18 = vst.msk [vmem:[#allocation3] sm:$0xff] %vm16_vm1, %v144_v4  ;;  %55 = vperm.xlu1 %109, %v21_v5   ;;  %s91_s1 = sshll.u32 %s145_s0, 4  ;;  %s92_s1 = int_to_ptr.vmem [resolvable:$true] %s91_s1 }
   0x5   :  { %19 = vst.msk [vmem:[#allocation4] sm:$0xff] %vm16_vm1, %v144_v4  ;;  %v50_v12 = vand.u32 127, %v49_v10 }
   0xa   :  { %v22_v6 = vld [vmem:[#allocation2] sm:$0xff] }
   0xb   :  { %v31_v25 = vld [vmem:[#allocation3] sm:$0xff] }
   0xc   :  { %v53_v20 = vld [vmem:[#allocation4] sm:$0xff] }
  0x76   :  { %v26_v7 = vpop.xlane.xlu0 %25  ;;  %v56_v11 = vpop.permute.xlu1 %55 }
  0x77   :  { %v27_v8 = vmax.f32 %v22_v6, %v26_v7  ;;  %vm57_vm2 = vcmp.eq.s32.totalorder %v50_v12, %v56_v11 }
  0x78   :  { %v58_v13 = vsel %vm57_vm2, %v20_v0, 0.0 }
  0x79   :  { %v28_v9 = vsub.f32 %v22_v6, %v27_v8  ;;  %47 = vst.msk [vmem:[#allocation2] sm:$0xff] %vm16_vm1, %v27_v8  ;;  %35 = vperm.xlu0 %108, %v27_v8   ;;  %v59_v14 = vsel %vm23_vm0, %v58_v13, 0.0 }
  0x7a   :  { %60 = vadd.xlane.f32.xlu2 %v59_v14 }
  0x7b   :  { %v29_v23 = vmul.f32 1.442695, %v28_v9 }
  0x80   :  { %v67_v32 = vld [vmem:[#allocation2] sm:$0xff] }
  0xeb   :  { %v36_v15 = vpop.permute.xlu0 %35 }
  0xec   :  { %v38_v16 = vsub.f32 %v20_v0, %v36_v15 }
  0xed   :  { %v61_v21 = vpop.xlane.xlu2 %60 }
  0xee   :  { %v39_v17 = vmul.f32 1.442695, %v38_v16  ;;  %v62_v22 = vadd.f32 %v61_v21, %v53_v20 }
  0xf0   :  { %110 = vpow2.f32 %v39_v17  ;;  %63 = vst.msk [vmem:[#allocation4] sm:$0xff] %vm16_vm1, %v62_v22 }
  0xf1   :  { %112 = vpow2.f32 %v29_v23 }
  0xf6   :  { %v111_v18 = vpop.eup %110 }
  0xf7   :  { %v41_v19 = vsel %vm23_vm0, %v111_v18, 0.0  ;;  %v113_v24 = vpop.eup %112  ;;  %v72_v33 = vld [vmem:[#allocation4] sm:$0xff] }
  0xf8   :  { %42 = vadd.xlane.f32.xlu1 %v41_v19  ;;  %v32_v26 = vmul.f32 %v113_v24, %v31_v25 }
 0x16b   :  { %v43_v27 = vpop.xlane.xlu1 %42 }
 0x16c   :  { %v44_v28 = vadd.f32 %v43_v27, %v32_v26 }
 0x16e   :  { %46 = vst.msk [vmem:[#allocation3] sm:$0xff] %vm16_vm1, %v44_v28 }
 0x175   :  { %v68_v29 = vld [vmem:[#allocation3] sm:$0xff] }
 0x176   :  { %114 = vlog2.f32 %v68_v29 }
 0x17c   :  { %v115_v30 = vpop.eup %114 }
 0x17d   :  { %v70_v31 = vmul.f32 0.6931472, %v115_v30 }
 0x17f   :  { %v71_v34 = vadd.f32 %v70_v31, %v67_v32 }
 0x181   :  { %v73_v35 = vsub.f32 %v71_v34, %v72_v33 }
 0x183   :  { %v74_v36 = vsel %vm16_vm1, %v73_v35, 0.0 }
 0x184   :  { %75 = vadd.xlane.f32.xlu2 %v74_v36 }
 0x1f7   :  { %v76_v37 = vpop.xlane.xlu2 %75 }
 0x1f8   :  { %v77_v38 = vrot.slane %v76_v37, 4 }
 0x1fa   :  { %v78_v39 = vadd.f32 %v77_v38, %v76_v37 }
 0x1fc   :  { %v79_v40 = vrot.slane %v78_v39, 2 }
 0x1fe   :  { %v80_v41 = vadd.f32 %v79_v40, %v78_v39 }
 0x200   :  { %v81_v42 = vrot.slane %v80_v41, 1 }
 0x202   :  { %v82_v43 = vadd.f32 %v81_v42, %v80_v41 }
 0x204   :  { %102 = vpush %v82_v43 }
 0x235   :  { %s103_s16 = spop %102 }
 0x236   :  { %v84_v44 = vstv %s103_s16 }
 0x237   :  { %85 = vst [vmem:[#allocation5] sm:$0xff] %v84_v44 }
 0x238   :  { %96 = dma.vmem_to_hbm [thread:$0]  %s92_s1, 128, %s94_s15, [#allocation6]  }
 0x239   :  { %140 = dma.done.wait [#allocation6], 128  }
 0x23a   :  { %141 = vsyncadd [#allocation6], 4294967168 }
 0x23b   :  { %101 = vsyncpa [#allocation6], 1 }

</bundles_post_ra>
